<compile_context>
chip_gen: v6e
topology: v6e:2x2x1
jax: 0.10.0
libtpu: 0.0.40
codegen_flags: <defaults>
</compile_context>

<pallas_src>
import functools
import math

import jax
import jax.numpy as jnp
from jax.experimental import pallas as pl
from jax.experimental.pallas import tpu as pltpu


def _sdpa_kernel(q_ref, k_ref, v_ref, o_ref, acc_ref, *, inv_scale):
    """One (batch, key-tile) grid step.

    q_ref: (Lq, H)   resident across the k grid axis
    k_ref: (tk, H)   current key tile
    v_ref: (tk, Hv)  current value tile
    o_ref: (Lq, Hv)  resident across the k grid axis (written on last step)
    acc_ref: (Lq, Hv) f32 VMEM accumulator scratch
    """
    k_step = pl.program_id(1)

    @pl.when(k_step == 0)
    def _():
        acc_ref[...] = jnp.zeros_like(acc_ref)

    # Fold 1/scale into Q (cheaper than scaling the (Lq, tk) score tile).
    q = q_ref[...] * inv_scale            # (Lq, H), input dtype
    k = k_ref[...]                        # (tk, H), input dtype
    v = v_ref[...]                        # (tk, Hv), input dtype

    # Scores for this key tile: (Lq, tk), MXU matmul with f32 accumulation.
    s = jax.lax.dot_general(
        q, k,
        dimension_numbers=(((1,), (1,)), ((), ())),
        preferred_element_type=jnp.float32,
    )

    # Softmax over the *query* axis (torch dim=-2): every key column is
    # normalized independently, so this is exact per key tile.
    m = jnp.max(s, axis=0, keepdims=True)          # (1, tk)
    e = jnp.exp(s - m)                             # (Lq, tk)
    denom = jnp.sum(e, axis=0, keepdims=True)      # (1, tk)
    # Multiply by the reciprocal instead of dividing the whole score tile.
    p = e * pl.reciprocal(denom, approx=False)     # (Lq, tk), f32
    p = p.astype(v.dtype)                          # native-dtype MXU matmul

    acc_ref[...] += jax.lax.dot_general(
        p, v,
        dimension_numbers=(((1,), (0,)), ((), ())),
        preferred_element_type=jnp.float32,
    )

    @pl.when(k_step == pl.num_programs(1) - 1)
    def _():
        o_ref[...] = acc_ref[...].astype(o_ref.dtype)


def _pick_tk(Lk, Lq):
    """Pick a key-tile size: multiple of 8, divides Lk, score tile <= ~4 MiB."""
    if Lk <= 128:
        return Lk
    budget = max(8, (4 << 20) // (4 * max(Lq, 1)))     # keep f32 (Lq, tk) small
    for cand in (2048, 1024, 512, 256, 128, 64, 32, 16, 8):
        if cand <= budget and Lk % cand == 0:
            return cand
    # TODO(synk): ragged Lk (no aligned divisor) would need in-kernel masking;
    # fall back to a single full-length key tile for correctness.
    return Lk


def scaled_dot_product_attention(Q, K, V, h, *, tk=None):
    """Pallas implementation of ScaledDotProductAttention(h).forward(Q, K, V)."""
    B, Lq, H = Q.shape
    Bk, Lk, Hk = K.shape
    Bv, Lkv, Hv = V.shape
    assert B == Bk == Bv and Lk == Lkv and H == Hk

    inv_scale = 1.0 / math.sqrt(h)                    # host-side, no device op

    if tk is None:
        tk = _pick_tk(Lk, Lq)
    if Lk % tk != 0:
        tk = Lk
    num_k = Lk // tk

    # VMEM budget: double-buffered input/output blocks + f32 accumulator +
    # f32 score intermediates, with headroom; clamp to stay v7x-safe (64 MiB).
    in_isz = jnp.dtype(Q.dtype).itemsize
    est = 2 * (Lq * H + tk * H + tk * Hv) * in_isz    # double-buffered inputs
    est += 2 * Lq * Hv * in_isz                       # double-buffered output
    est += Lq * Hv * 4                                # f32 accumulator
    est += 2 * Lq * tk * 4                            # score / exp temporaries
    vmem_limit = min(max(int(1.25 * est) + (4 << 20), 16 << 20), 64 << 20)

    kernel = functools.partial(_sdpa_kernel, inv_scale=inv_scale)

    return pl.pallas_call(
        kernel,
        out_shape=jax.ShapeDtypeStruct((B, Lq, Hv), Q.dtype),
        grid_spec=pltpu.PrefetchScalarGridSpec(
            num_scalar_prefetch=0,
            grid=(B, num_k),
            in_specs=[
                # Batch dim squeezed out of the kernel refs (2-D tiles).
                pl.BlockSpec((None, Lq, H), lambda b, k: (b, 0, 0)),
                pl.BlockSpec((None, tk, H), lambda b, k: (b, k, 0)),
                pl.BlockSpec((None, tk, Hv), lambda b, k: (b, k, 0)),
            ],
            out_specs=pl.BlockSpec((None, Lq, Hv), lambda b, k: (b, 0, 0)),
            scratch_shapes=[pltpu.VMEM((Lq, Hv), jnp.float32)],
        ),
        compiler_params=pltpu.CompilerParams(
            dimension_semantics=("parallel", "arbitrary"),
            vmem_limit_bytes=vmem_limit,
        ),
    )(Q, K, V)


def _reference(Q, K, V, h):
    scale = math.sqrt(h)
    qk = jnp.einsum("bqd,bkd->bqk", Q.astype(jnp.float32),
                    K.astype(jnp.float32)) / scale
    qk = jax.nn.softmax(qk, axis=-2)                  # dim=-2, as in torch
    return jnp.einsum("bqk,bkd->bqd", qk, V.astype(jnp.float32))


if __name__ == "__main__":
    key = jax.random.PRNGKey(0)
    kq, kk, kv = jax.random.split(key, 3)

    # Small shapes consistent with the module: batch=2, seq=8, hidden=32.
    B, Lq, Lk, H = 2, 8, 8, 32
    Q = jax.random.normal(kq, (B, Lq, H), dtype=jnp.float32)
    K = jax.random.normal(kk, (B, Lk, H), dtype=jnp.float32)
    V = jax.random.normal(kv, (B, Lk, H), dtype=jnp.float32)

    out = scaled_dot_product_attention(Q, K, V, h=H)
    out = jax.block_until_ready(out)
    ref = _reference(Q, K, V, h=H)
    assert out.shape == (B, Lq, H)
    assert jnp.allclose(out, ref, atol=1e-5, rtol=1e-5)

    # Secondary check exercising the key-tiled accumulator path (num_k > 1).
    B2, Lq2, Lk2 = 2, 128, 256
    Q2 = jax.random.normal(kq, (B2, Lq2, H), dtype=jnp.float32)
    K2 = jax.random.normal(kk, (B2, Lk2, H), dtype=jnp.float32)
    V2 = jax.random.normal(kv, (B2, Lk2, H), dtype=jnp.float32)
    out2 = jax.block_until_ready(
        scaled_dot_product_attention(Q2, K2, V2, h=H, tk=64))
    ref2 = _reference(Q2, K2, V2, h=H)
    assert jnp.allclose(out2, ref2, atol=1e-4, rtol=1e-4)

    print("KERNEL_OK")
</pallas_src>

<mosaic_0001>
module attributes {stable_mosaic.version = 11 : i64} {
  func.func @_sdpa_kernel(%arg0: i32, %arg1: i32, %arg2: memref<1x8x32xf32, #tpu.memory_space<vmem>>, %arg3: memref<1x8x32xf32, #tpu.memory_space<vmem>>, %arg4: memref<1x8x32xf32, #tpu.memory_space<vmem>>, %arg5: memref<1x8x32xf32, #tpu.memory_space<vmem>>, %arg6: memref<8x32xf32, #tpu.memory_space<vmem>>) attributes {dimension_semantics = [#tpu.dimension_semantics<parallel>, #tpu.dimension_semantics<arbitrary>], iteration_bounds = array<i64: 2, 1>, scalar_prefetch = 0 : i64, scratch_operands = 1 : i64, tpu.core_type = #tpu.core_type<tc>, window_params = [{transform_indices = @transform_0, window_bounds = array<i64: 1, 8, 32>}, {transform_indices = @transform_1, window_bounds = array<i64: 1, 8, 32>}, {transform_indices = @transform_2, window_bounds = array<i64: 1, 8, 32>}, {transform_indices = @transform_3, window_bounds = array<i64: 1, 8, 32>}]} {
    %c0_i32 = arith.constant 0 : i32
    %0 = arith.cmpi eq, %arg1, %c0_i32 : i32
    %1 = arith.extui %0 : i1 to i32
    %c0_i32_0 = arith.constant 0 : i32
    %2 = arith.cmpi ne, %1, %c0_i32_0 : i32
    scf.if %2 {
      %cst_19 = arith.constant 0.000000e+00 : f32
      %29 = vector.broadcast %cst_19 : f32 to vector<8x32xf32>
      %c0_20 = arith.constant 0 : index
      %c0_21 = arith.constant 0 : index
      %30 = vector.load %arg6[%c0_20, %c0_21] : memref<8x32xf32, #tpu.memory_space<vmem>>, vector<8x32xf32>
      tpu.vector_store %arg6[%c0_20, %c0_21], %29 {strides = array<i32>} : memref<8x32xf32, #tpu.memory_space<vmem>>, vector<8x32xf32>,
    } else {
    }
    %c0 = arith.constant 0 : index
    %c0_1 = arith.constant 0 : index
    %c0_2 = arith.constant 0 : index
    %3 = vector.load %arg2[%c0, %c0_1, %c0_2] : memref<1x8x32xf32, #tpu.memory_space<vmem>>, vector<1x8x32xf32>
    %4 = vector.shape_cast %3 : vector<1x8x32xf32> to vector<8x32xf32>
    %cst = arith.constant 0.176776692 : f32
    %5 = vector.broadcast %cst : f32 to vector<8x32xf32>
    %6 = arith.mulf %4, %5 : vector<8x32xf32>
    %c0_3 = arith.constant 0 : index
    %c0_4 = arith.constant 0 : index
    %c0_5 = arith.constant 0 : index
    %7 = vector.load %arg3[%c0_3, %c0_4, %c0_5] : memref<1x8x32xf32, #tpu.memory_space<vmem>>, vector<1x8x32xf32>
    %8 = vector.shape_cast %7 : vector<1x8x32xf32> to vector<8x32xf32>
    %c0_6 = arith.constant 0 : index
    %c0_7 = arith.constant 0 : index
    %c0_8 = arith.constant 0 : index
    %9 = vector.load %arg4[%c0_6, %c0_7, %c0_8] : memref<1x8x32xf32, #tpu.memory_space<vmem>>, vector<1x8x32xf32>
    %10 = vector.shape_cast %9 : vector<1x8x32xf32> to vector<8x32xf32>
    %cst_9 = arith.constant dense<0.000000e+00> : vector<8x8xf32>
    %11 = tpu.matmul %6, %8, %cst_9 {dimension_numbers = #tpu.dot_dimension_numbers<[1], [1], [0], [0], [0, 0, 1, 0], [], []>} : vector<8x32xf32>, vector<8x32xf32>, vector<8x8xf32> -> vector<8x8xf32>
    %cst_10 = arith.constant dense<0xFF800000> : vector<8xf32>
    %12 = vector.multi_reduction <maximumf>, %11, %cst_10 [0] : vector<8x8xf32> to vector<8xf32>
    %13 = vector.shape_cast %12 : vector<8xf32> to vector<1x8xf32>
    %14 = vector.broadcast %13 : vector<1x8xf32> to vector<8x8xf32>
    %15 = arith.subf %11, %14 : vector<8x8xf32>
    %16 = math.exp %15 : vector<8x8xf32>
    %cst_11 = arith.constant dense<0.000000e+00> : vector<8xf32>
    %17 = vector.multi_reduction <add>, %16, %cst_11 [0] : vector<8x8xf32> to vector<8xf32>
    %18 = vector.shape_cast %17 : vector<8xf32> to vector<1x8xf32>
    %19 = tpu.reciprocal %18 : vector<1x8xf32> -> vector<1x8xf32>
    %20 = vector.broadcast %19 : vector<1x8xf32> to vector<8x8xf32>
    %21 = arith.mulf %16, %20 : vector<8x8xf32>
    %c0_12 = arith.constant 0 : index
    %c0_13 = arith.constant 0 : index
    %22 = vector.load %arg6[%c0_12, %c0_13] : memref<8x32xf32, #tpu.memory_space<vmem>>, vector<8x32xf32>
    %cst_14 = arith.constant dense<0.000000e+00> : vector<8x32xf32>
    %23 = tpu.matmul %21, %10, %cst_14 {dimension_numbers = #tpu.dot_dimension_numbers<[1], [0], [0], [1], [0, 0, 1, 1], [], []>} : vector<8x8xf32>, vector<8x32xf32>, vector<8x32xf32> -> vector<8x32xf32>
    %24 = arith.addf %22, %23 : vector<8x32xf32>
    %c0_15 = arith.constant 0 : index
    %c0_16 = arith.constant 0 : index
    %25 = vector.load %arg6[%c0_15, %c0_16] : memref<8x32xf32, #tpu.memory_space<vmem>>, vector<8x32xf32>
    tpu.vector_store %arg6[%c0_15, %c0_16], %24 {strides = array<i32>} : memref<8x32xf32, #tpu.memory_space<vmem>>, vector<8x32xf32>,
    %c0_i32_17 = arith.constant 0 : i32
    %26 = arith.cmpi eq, %arg1, %c0_i32_17 : i32
    %27 = arith.extui %26 : i1 to i32
    %c0_i32_18 = arith.constant 0 : i32
    %28 = arith.cmpi ne, %27, %c0_i32_18 : i32
    scf.if %28 {
      %c0_19 = arith.constant 0 : index
      %c0_20 = arith.constant 0 : index
      %29 = vector.load %arg6[%c0_19, %c0_20] : memref<8x32xf32, #tpu.memory_space<vmem>>, vector<8x32xf32>
      %c0_21 = arith.constant 0 : index
      %c0_22 = arith.constant 0 : index
      %c0_23 = arith.constant 0 : index
      %30 = vector.load %arg5[%c0_21, %c0_22, %c0_23] : memref<1x8x32xf32, #tpu.memory_space<vmem>>, vector<1x8x32xf32>
      %31 = vector.shape_cast %30 : vector<1x8x32xf32> to vector<8x32xf32>
      %32 = vector.shape_cast %29 : vector<8x32xf32> to vector<1x8x32xf32>
      tpu.vector_store %arg5[%c0_21, %c0_22, %c0_23], %32 {strides = array<i32>} : memref<1x8x32xf32, #tpu.memory_space<vmem>>, vector<1x8x32xf32>,
    } else {
    }
    return
  }
  func.func @transform_0(%arg0: i32, %arg1: i32) -> (i32, i32, i32) {
    %c0_i32 = arith.constant 0 : i32
    %c0_i32_0 = arith.constant 0 : i32
    %c0_i32_1 = arith.constant 0 : i32
    return %arg0, %c0_i32, %c0_i32_0 : i32, i32, i32
  }
  func.func @transform_1(%arg0: i32, %arg1: i32) -> (i32, i32, i32) {
    %c0_i32 = arith.constant 0 : i32
    %c0_i32_0 = arith.constant 0 : i32
    return %arg0, %arg1, %c0_i32 : i32, i32, i32
  }
  func.func @transform_2(%arg0: i32, %arg1: i32) -> (i32, i32, i32) {
    %c0_i32 = arith.constant 0 : i32
    %c0_i32_0 = arith.constant 0 : i32
    return %arg0, %arg1, %c0_i32 : i32, i32, i32
  }
  func.func @transform_3(%arg0: i32, %arg1: i32) -> (i32, i32, i32) {
    %c0_i32 = arith.constant 0 : i32
    %c0_i32_0 = arith.constant 0 : i32
    %c0_i32_1 = arith.constant 0 : i32
    return %arg0, %c0_i32, %c0_i32_0 : i32, i32, i32
  }
}

</mosaic_0001>

<bundles_post_ra>
// kernel: tpu_custom_call.1
= control target key start
LH: loop header
LB: loop body
LE: loop exit
PB: predicated region body
PF: predicated region fallthrough
CT: control target
= control target key end

     0   :  { %s1122_s0 = inlined_call_operand.hbm [shape: f32[2,8,32], index: 0, kind: input, shape index: {}]   ;;  %s1123_s1 = inlined_call_operand.hbm [shape: f32[2,8,32], index: 1, kind: input, shape index: {}]   ;;  %s1124_s2 = inlined_call_operand.hbm [shape: f32[2,8,32], index: 2, kind: input, shape index: {}]   ;;  %s1125_s3 = inlined_call_operand.hbm [shape: f32[2,8,32], index: 3, kind: output, shape index: {}]  }
   0x1   :  { %1129 = sst [smem:[#allocation15_spill]] %s1123_s1 }
   0x2   :  { %8 = vsyncpa [#allocation4], 0 }
   0x3   :  { %10 = vsyncpa [#allocation4 + $0x1], 0 }
   0x4   :  { %11 = vsyncpa [#allocation7], 0 }
   0x5   :  { %13 = vsyncpa [#allocation7 + $0x1], 0 }
   0x6   :  { %14 = vsyncpa [#allocation5], 0 }
   0x7   :  { %16 = vsyncpa [#allocation5 + $0x1], 0  ;;  %s910_s12 = smov 0   ;;  %s912_s13 = smov 0  }
   0x8   :  { %s914_s14 = smov 0   ;;  %s916_s15 = smov 0  }
   0x9   :  { %s918_s16 = smov 0   ;;  %s920_s17 = smov 0  }
   0xa LB: > { %1130 = sst [smem:[#allocation13_spill]] %s878_s16  ;;  %s941_s18 = sadd.s32 4294967295, %s882_s17   ;;  %s882_s17 = sphi %s920_s17, %s22_s17   ;;  %s878_s16 = sphi %s918_s16, %s1142_s16   ;;  %s874_s15 = sphi %s916_s15, %s1141_s15   ;;  %s870_s14 = sphi %s914_s14, %s1145_s14   ;;  %s866_s13 = sphi %s912_s13, %s1144_s13   ;;  %s862_s12 = sphi %s910_s12, %s1143_s12  }
   0xb   : > { %s601_s19 = sadd.s32 4294967294, %s882_s17   ;;  %s34_s20 = sadd.s32 1, %s878_s16 }
   0xc   : > { %s41_s21 = sadd.s32 1, %s870_s14  ;;  %p36_p0 = scmp.ge.s32.totalorder %s34_s20, 2 }
   0xd   : > { %p48_p1 = scmp.ne.s32.totalorder %s870_s14, %s866_s13  ;;  %p49_p2 = scmp.eq.s32.totalorder %s882_s17, 0 }
   0xe   : > { %p54_p3 = scmp.ne.s32.totalorder %s866_s13, %s862_s12  ;;  %s1147_s20 = smov (%p36_p0, %s34_s20), 0 }
   0xf   : > { %1131 = sst [smem:[#allocation14_spill]] %s1147_s20  ;;  %p953_p4 = por %p49_p2, %p48_p1 }
  0x10   : > { %p55_p5 = scmp.eq.s32.totalorder %s941_s18, 0  ;;  %s38_s23 = ssub.s32 %s878_s16, %s1147_s20 }
  0x11   : > { %p134_p6 = scmp.eq.s32.totalorder %s941_s18, 1  ;;  %p39_p7 = scmp.eq.s32.totalorder %s38_s23, 0 }
  0x12   : > { %p961_p8 = por %p55_p5, %p54_p3  ;;  %p140_p10 = scmp.eq.s32.totalorder %s601_s19, 1 }
  0x13   : > { %p965_p9 = por %p134_p6, %p48_p1  ;;  %p658_p13 = scmp.lt.s32.totalorder %s882_s17, 2 }
  0x14   : > { %s970_s26 = scalar_select %p39_p7, %s870_s14, %s41_s21  }
  0x15   : > { %p972_p11 = por %p140_p10, %p54_p3  ;;  %s1126_s28 = sand.u32 1, %s870_s14  }
  0x16   : > { %s981_s29 = sshll.u32 %s1126_s28, 3  ;;  %s984_s30 = sshll.u32 %s878_s16, 7 }
  0x17   : > { %p988_p0 = pnand %p658_p13, %p953_p4  ;;  %s178_s5 = sand.u32 1, %s882_s17  }
  0x18   : > { %s1137_s1 = sld [smem:[#allocation15_spill]]  ;;  %s182_s9 = scalar_lea.vmem [#allocation6], %s981_s29 }
  0x19   : > { %s190_s10 = sshll.u32 %s182_s9, 4  ;;  %p610_p1 = scmp.ge.s32.totalorder %s882_s17, 1  ;;  %s191_s10 = int_to_ptr.vmem [resolvable:$true] %s190_s10 }
  0x1a   : > { %p214_p2 = scmp.lt.s32.totalorder %s882_s17, 3  ;;  %s1000_s11 = scalar_lea.sflag [#allocation7], %s178_s5 }
  0x1b   : > { %p716_p3 = pneg %p988_p0  ;;  %s727_s19 = scalar_lea.vmem %s191_s10, 128 }
  0x1c   : > { %p728_p4 = scmp.ne.s32.totalorder %s191_s10, %s727_s19  ;;  %s884_s21 = smov [#allocation6]  }
  0x1d   : > { %s732_s22 = sshll.u32 %s884_s21, 4  ;;  %s733_s22 = int_to_ptr.vmem [resolvable:$false] %s732_s22 }
  0x1e   : > { %s188_s8 = scalar_lea.hbm %s1137_s1, %s984_s30  ;;  %p730_p5 = pnand %p728_p4, %p716_p3 }
  0x1f   : > { %s734_s23 = scalar_lea.vmem %s733_s22, 256  ;;  %p735_p7 = scmp.lt.s32.totalorder %s191_s10, %s733_s22 }
  0x20   : > { %p731_p6 = pneg %p730_p5  ;;  %p736_p10 = scmp.lt.s32.totalorder %s734_s23, %s727_s19 }
  0x22   : > { %p737_p13 = por %p736_p10, %p735_p7 }
  0x24   : > { %p738_p12 = pnand %p737_p13, %p731_p6 }
  0x26   : > { %741 = shalt.err (!%p738_p12)
}
  0x27   : > { %650 = dma.hbm_to_vmem [thread:$0]  (!%p988_p0), %s188_s8, 128, %s191_s10, %s1000_s11  }
  0x28   : > { %p1014_p4 = pnand %p610_p1, %p214_p2  ;;  %s169_s9 = scalar_lea.hbm %s1122_s0, %s984_s30 }
  0x29   : > { %s164_s19 = scalar_lea.vmem [#allocation3], %s981_s29  ;;  %s207_s28 = scalar_lea.hbm %s1124_s2, %s984_s30 }
  0x2a   : > { %s171_s21 = sshll.u32 %s164_s19, 4  ;;  %s1139_s1 = sand.u32 1, %s870_s14   ;;  %s172_s21 = int_to_ptr.vmem [resolvable:$true] %s171_s21 }
  0x2b   : > { %s161_s20 = scalar_lea.sflag [#allocation4], %s1139_s1  ;;  %s755_s8 = scalar_lea.vmem %s172_s21, 128 }
  0x2c   : > { %p756_p12 = scmp.ne.s32.totalorder %s172_s21, %s755_s8  ;;  %s885_s10 = smov [#allocation3]  }
  0x2d   : > { %s760_s16 = sshll.u32 %s885_s10, 4  ;;  %s761_s16 = int_to_ptr.vmem [resolvable:$false] %s760_s16 }
  0x2e   : > { %p758_p1 = pnand %p756_p12, %p716_p3  ;;  %s762_s6 = scalar_lea.vmem %s761_s16, 256 }
  0x2f   : > { %p763_p5 = scmp.lt.s32.totalorder %s172_s21, %s761_s16  ;;  %p764_p6 = scmp.lt.s32.totalorder %s762_s6, %s755_s8 }
  0x30   : > { %p759_p2 = pneg %p758_p1 }
  0x31   : > { %p765_p7 = por %p764_p6, %p763_p5 }
  0x33   : > { %p766_p10 = pnand %p765_p7, %p759_p2 }
  0x35   : > { %769 = shalt.err (!%p766_p10)
}
  0x36   : > { %647 = dma.hbm_to_vmem [thread:$0]  (!%p988_p0), %s169_s9, 128, %s172_s21, %s161_s20  }
  0x37   : > { %s201_s1 = scalar_lea.vmem [#allocation8], %s981_s29  ;;  %s886_s22 = smov [#allocation8]  }
  0x38   : > { %s209_s7 = sshll.u32 %s201_s1, 4  ;;  %s788_s16 = sshll.u32 %s886_s22, 4  ;;  %s210_s7 = int_to_ptr.vmem [resolvable:$true] %s209_s7  ;;  %s789_s16 = int_to_ptr.vmem [resolvable:$false] %s788_s16 }
  0x39   : > { %s783_s19 = scalar_lea.vmem %s210_s7, 128  ;;  %s790_s23 = scalar_lea.vmem %s789_s16, 256 }
  0x3a   : > { %p784_p13 = scmp.ne.s32.totalorder %s210_s7, %s783_s19  ;;  %p791_p2 = scmp.lt.s32.totalorder %s210_s7, %s789_s16 }
  0x3b   : > { %p792_p5 = scmp.lt.s32.totalorder %s790_s23, %s783_s19 }
  0x3c   : > { %p786_p12 = pnand %p784_p13, %p716_p3 }
  0x3d   : > { %p793_p6 = por %p792_p5, %p791_p2 }
  0x3e   : > { %p787_p1 = pneg %p786_p12 }
  0x40   : > { %p794_p7 = pnand %p793_p6, %p787_p1 }
  0x42   : > { %797 = shalt.err (!%p794_p7)
}
  0x43   : > { %653 = dma.hbm_to_vmem [thread:$0]  (!%p988_p0), %s207_s28, 128, %s210_s7, %s1000_s11  }
  0x44   : > { %218 = sbr.rel (%p1014_p4) target bundleno = 552 (0x228), region = 32  ;;  %s1049_s9 = sand.u32 (!%p1014_p4), 1, %s866_s13  }
  0x45   : > { %s1052_s21 = sshll.u32 (!%p1014_p4), %s1049_s9, 3  ;;  %s221_s4 = scalar_lea.sflag (!%p1014_p4), [#allocation4], %s1049_s9 }
  0x46   : > { %s224_s8 = scalar_lea.vmem (!%p1014_p4), [#allocation3], %s1052_s21 }
  0x49   : > { %849 = dma.done.wait (%p961_p8), %s221_s4, 128  }
  0x4a   : > { %851 = vsyncadd (%p961_p8), %s221_s4, 4294967168  ;;  %s229_s28 = sand.u32 1, %s941_s18   ;;  %s233_s11 = scalar_lea.vmem [#allocation6], %s1052_s21 }
  0x4b   : > { %s230_s30 = scalar_lea.sflag [#allocation7], %s229_s28 }
  0x4c   : > { %853 = dma.done.wait (%p961_p8), %s230_s30, 256  }
  0x4d   : > { %855 = vsyncadd (%p961_p8), %s230_s30, 4294967040  ;;  %vm279_vm0 = vcmask 261120   ;;  %v887_v0 = vmov 0.0   ;;  %vm888_vm1 = vmmov 0   ;;  %v283_v1 = vld [vmem:[%s233_s11] sm:$0xff]  ;;  %v281_v2 = vld [vmem:[%s224_s8] sm:$0xff] }
  0x4e   : > { %626 = vmatprep.subr.mxu0 %v887_v0  ;;  %280 = vst.msk [vmem:[#allocation2] sm:$0xff] %vm279_vm0, %v887_v0  ;;  %628 = vmatprep.mubr.msk.f32.mxu0 %vm888_vm1, %v887_v0  ;;  %v282_v3 = vmul.f32 0.17677669, %v281_v2  ;;  %s242_s18 = scalar_lea.vmem [#allocation8], %s1052_s21  ;;  %vm362_vm2 = vcmask 64512   ;;  %s619_s24 = sshll.u32 %s874_s15, 7 }
  0x4f   : > { %631 = vmatprep.subr.mxu1 %v887_v0  ;;  %633 = vmatprep.mubr.msk.f32.mxu1 %vm888_vm1, %v887_v0  ;;  %v284_v4 = vld [vmem:[%s242_s18] sm:$0xff]  ;;  %s274_s5 = scalar_lea.vmem [#allocation9], %s1052_s21  ;;  %s1079_s7 = scalar_lea.hbm %s1125_s3, %s619_s24 }
  0x50   : > { %627 = vmatpush3.xpose.msk.msra.mxu0 %vm279_vm0, %v283_v1  ;;  %632 = vmatpush3.msra.mxu1 %v284_v4  ;;  %s477_s10 = sshll.u32 %s274_s5, 4  ;;  %s464_s19 = scalar_lea.sflag [#allocation5], %s1049_s9  ;;  %s478_s10 = int_to_ptr.vmem [resolvable:$true] %s477_s10 }
  0x51   : > { %s798_s22 = scalar_lea.vmem %s478_s10, 128  ;;  %s889_s16 = smov [#allocation9]  }
  0x52   : > { %p799_p8 = scmp.ne.s32.totalorder %s478_s10, %s798_s22  ;;  %s802_s23 = sshll.u32 %s889_s16, 4  ;;  %s803_s23 = int_to_ptr.vmem [resolvable:$false] %s802_s23 }
  0x53   : > { %629 = vmatmul.mubr.msk.f32.vlgmr.msra.gmra.mxu0 %vm279_vm0, %v282_v3  ;;  %s804_s15 = scalar_lea.vmem %s803_s23, 256  ;;  %p805_p4 = scmp.lt.s32.totalorder %s478_s10, %s803_s23 }
  0x54   : > { %p800_p0 = pnand %p799_p8, %p965_p9  ;;  %p806_p10 = scmp.lt.s32.totalorder %s804_s15, %s798_s22 }
  0x55   : > { %v382_v26 = vld [vmem:[#allocation2] sm:$0xff] }
  0x56   : > { %p801_p3 = pneg %p800_p0  ;;  %p807_p13 = por %p806_p10, %p805_p4 }
  0x58   : > { %p808_p12 = pnand %p807_p13, %p801_p3 }
 0x113   : > { %v358_v5 = vpop.f32.mrf.mxu0 }
 0x114   : > { %v363_v6 = vsel %vm362_vm2, %v358_v5, -inf }
 0x115   : > { %v364_v7 = vrot.slane %v363_v6, 4  ;;  %v630_v8 = vpop.f32.mrf.mxu0 }
 0x117   : > { %v365_v9 = vmax.f32 %v363_v6, %v364_v7 }
 0x119   : > { %v366_v10 = vrot.slane %v365_v9, 2 }
 0x11b   : > { %v367_v11 = vmax.f32 %v365_v9, %v366_v10 }
 0x11d   : > { %v368_v12 = vrot.slane %v367_v11, 1 }
 0x11f   : > { %v369_v13 = vmax.f32 %v367_v11, %v368_v12 }
 0x121   : > { %v370_v14 = vsub.f32 %v358_v5, %v369_v13 }
 0x123   : > { %v371_v15 = vmul.f32 1.442695, %v370_v14 }
 0x125   : > { %710 = vpow2.f32 %v371_v15 }
 0x132   : > { %v711_v16 = vpop.eup %710 }
 0x133   : > { %v373_v17 = vsel %vm362_vm2, %v711_v16, 0.0 }
 0x134   : > { %v374_v18 = vrot.slane %v373_v17, 4 }
 0x136   : > { %v375_v19 = vadd.f32 %v374_v18, %v373_v17 }
 0x138   : > { %v376_v20 = vrot.slane %v375_v19, 2 }
 0x13a   : > { %v377_v21 = vadd.f32 %v376_v20, %v375_v19 }
 0x13c   : > { %v378_v22 = vrot.slane %v377_v21, 1 }
 0x13e   : > { %v379_v23 = vadd.f32 %v378_v22, %v377_v21 }
 0x140   : > { %712 = vrcp.f32 %v379_v23 }
 0x14d   : > { %v713_v24 = vpop.eup %712 }
 0x14e   : > { %v381_v25 = vmul.f32 %v713_v24, %v711_v16 }
 0x150   : > { %634 = vmatmul.mubr.msk.f32.vlgmr.msra.gmra.mxu1 %vm362_vm2, %v381_v25 }
 0x210   : > { %v452_v27 = vpop.f32.mrf.mxu1 }
 0x211   : > { %v456_v28 = vadd.f32 %v452_v27, %v382_v26 }
 0x212   : > { %v635_v29 = vpop.f32.mrf.mxu1 }
 0x213   : > { %457 = vst.msk [vmem:[#allocation2] sm:$0xff] %vm279_vm0, %v456_v28 }
 0x21a   : > { %v461_v30 = vld [vmem:[#allocation2] sm:$0xff] }
 0x21b   : > { %462 = vst.msk [vmem:[%s274_s5] sm:$0xff] %vm279_vm0, %v461_v30 }
 0x21c   : > { %811 = shalt.err (!%p808_p12)
}
 0x21d   : > { %s812_s20 = scalar_lea.hbm %s1079_s7, 128  ;;  %s816_s21 = scalar_lea.hbm %s1125_s3, 256 }
 0x21e   : > { %p813_p1 = scmp.ne.s32.totalorder %s1079_s7, %s812_s20  ;;  %p817_p6 = scmp.lt.s32.totalorder %s1079_s7, %s1125_s3 }
 0x21f   : > { %p818_p7 = scmp.lt.s32.totalorder %s816_s21, %s812_s20 }
 0x220   : > { %p814_p2 = pnand %p813_p1, %p965_p9 }
 0x221   : > { %p819_p8 = por %p818_p7, %p817_p6 }
 0x222   : > { %p815_p5 = pneg %p814_p2 }
 0x224   : > { %p820_p0 = pnand %p819_p8, %p815_p5 }
 0x226   : > { %823 = shalt.err (!%p820_p0)
}
 0x227   : > { %642 = dma.vmem_to_hbm [thread:$0]  (%p965_p9), %s478_s10, 128, %s1079_s7, %s464_s19  }
 0x228 PF: > { %s489_s28 = sand.u32 1, %s862_s12   ;;  %p1140_p3 = scmp.ge.s32.totalorder %s882_s17, 2 }
 0x229   : > { %s490_s30 = scalar_lea.sflag [#allocation5], %s489_s28 }
 0x22a   : > { %p655_p4 = pnand %p1140_p3, %p972_p11 }
 0x22c   : > { %p656_p10 = pneg %p655_p4 }
 0x22e   : > { %857 = dma.done.wait (%p656_p10), %s490_s30, 128  }
 0x22f   : > { %859 = vsyncadd (%p656_p10), %s490_s30, 4294967168  ;;  %s22_s17 = sadd.s32 1, %s882_s17   ;;  %s1141_s15 = sld [smem:[#allocation13_spill]] }
 0x230   : > { %p19_p13 = scmp.ge.s32.totalorder %s22_s17, 4   ;;  %s1142_s16 = sld [smem:[#allocation14_spill]] }
 0x231   : > { %s1143_s12 = smov %s866_s13  ;;  %s1144_s13 = smov %s870_s14 }
 0x232   : > { %s1145_s14 = smov %s970_s26  ;;  %21 = sbr.rel (!%p19_p13) target bundleno = 10 (0xa), region = 109 }
 0x237   :  { %495 = vsyncpa [#allocation4], 1 }
 0x238   :  { %497 = vsyncpa [#allocation4 + $0x1], 1 }
 0x239   :  { %498 = vsyncpa [#allocation7], 1 }
 0x23a   :  { %500 = vsyncpa [#allocation7 + $0x1], 1 }
 0x23b   :  { %501 = vsyncpa [#allocation5], 1 }
 0x23c   :  { %503 = vsyncpa [#allocation5 + $0x1], 1 }

</bundles_post_ra>
